<compile_context>
chip_gen: v6e
topology: v6e:2x2x1
jax: 0.10.0
libtpu: 0.0.40
codegen_flags: <defaults>
</compile_context>

<pallas_src>
import jax
import jax.numpy as jnp
from jax.experimental import pallas as pl
from jax.experimental.pallas import tpu as pltpu

D_IN, D_HID, D_OUT = 512, 256, 512


def mlp_kernel(x_ref, w1_ref, b1_ref, w2_ref, b2_ref, o_ref):
    """One batch tile: o = relu(x @ w1 + b1) @ w2 + b2 (f32 accumulation)."""
    x = x_ref[...]
    # fc1: initialize the accumulator with the broadcast bias (saves a
    # separate full-tile VPU add + temporary).
    h = b1_ref[...] + jnp.dot(x, w1_ref[...], preferred_element_type=jnp.float32)
    h = jnp.maximum(h, 0.0)
    # Match the fc2 MXU operand dtype to the weights (bf16 in the default
    # low-precision path; a no-op in the f32 path).
    h = h.astype(w2_ref.dtype)
    y = b2_ref[...] + jnp.dot(h, w2_ref[...], preferred_element_type=jnp.float32)
    o_ref[...] = y.astype(o_ref.dtype)


def _batch_dim_semantics():
    """CORE_PARALLEL on v7x (2 TensorCores/chip), PARALLEL elsewhere."""
    try:
        kind = jax.devices()[0].device_kind.lower()
    except Exception:  # pragma: no cover - defensive; fall back to PARALLEL
        kind = ""
    if "v7" in kind:
        return (pltpu.CORE_PARALLEL,)
    return (pltpu.PARALLEL,)


def net_forward(x, w1_t, b1, w2_t, b2, *, tile_b=512,
                compute_dtype=jnp.bfloat16):
    """Forward pass of Net.

    x:     (B, 512)   activations
    w1_t:  (512, 256) fc1 weight, pre-transposed to [in, out]
    b1:    (256,)     fc1 bias
    w2_t:  (256, 512) fc2 weight, pre-transposed to [in, out]
    b2:    (512,)     fc2 bias
    tile_b: batch tile for the gridded path (keep a multiple of 256).
    compute_dtype: MXU operand dtype (default bf16; accumulation, biases and
                   the output stay f32).  Pass jnp.float32 for exact f32.
                   Callers can pre-cast x / weights to avoid the in-wrapper
                   cast (it is a no-op if dtypes already match).
    """
    B, d_in = x.shape
    d_hid = w1_t.shape[1]
    d_out = w2_t.shape[1]
    out_dtype = x.dtype  # captured before any operand cast

    if compute_dtype is not None:
        if x.dtype != compute_dtype:
            x = x.astype(compute_dtype)
        if w1_t.dtype != compute_dtype:
            w1_t = w1_t.astype(compute_dtype)
        if w2_t.dtype != compute_dtype:
            w2_t = w2_t.astype(compute_dtype)

    # Biases as lane-aligned (1, N) f32 rows; added to the f32 accumulator.
    b1_2d = b1.reshape(1, d_hid).astype(jnp.float32)
    b2_2d = b2.reshape(1, d_out).astype(jnp.float32)

    if B <= tile_b:
        # ---- Small-batch path: single invocation, no grid / pipeline loop,
        # full arrays resident in VMEM (weight DMA dominates latency here). ----
        vmem = pltpu.MemorySpace.VMEM
        return pl.pallas_call(
            mlp_kernel,
            out_shape=jax.ShapeDtypeStruct((B, d_out), out_dtype),
            in_specs=[
                pl.BlockSpec(memory_space=vmem),  # x
                pl.BlockSpec(memory_space=vmem),  # w1_t
                pl.BlockSpec(memory_space=vmem),  # b1
                pl.BlockSpec(memory_space=vmem),  # w2_t
                pl.BlockSpec(memory_space=vmem),  # b2
            ],
            out_specs=pl.BlockSpec(memory_space=vmem),
        )(x, w1_t, b1_2d, w2_t, b2_2d)

    # ---- Tiled path: batch grid (ragged last block handled by Pallas, no
    # wrapper pad/slice), weights resident, activation tiles pipelined. ----
    n_tiles = pl.cdiv(B, tile_b)

    return pl.pallas_call(
        mlp_kernel,
        out_shape=jax.ShapeDtypeStruct((B, d_out), out_dtype),
        grid_spec=pl.GridSpec(
            grid=(n_tiles,),
            in_specs=[
                pl.BlockSpec((tile_b, d_in), lambda i: (i, 0)),   # x tile
                pl.BlockSpec((d_in, d_hid), lambda i: (0, 0)),    # w1 (resident)
                pl.BlockSpec((1, d_hid), lambda i: (0, 0)),       # b1 (resident)
                pl.BlockSpec((d_hid, d_out), lambda i: (0, 0)),   # w2 (resident)
                pl.BlockSpec((1, d_out), lambda i: (0, 0)),       # b2 (resident)
            ],
            out_specs=pl.BlockSpec((tile_b, d_out), lambda i: (i, 0)),
        ),
        compiler_params=pltpu.CompilerParams(
            dimension_semantics=_batch_dim_semantics(),
        ),
    )(x, w1_t, b1_2d, w2_t, b2_2d)


def reference_forward(x, w1_t, b1, w2_t, b2):
    h = jnp.maximum(x @ w1_t + b1, 0.0)
    return h @ w2_t + b2


if __name__ == "__main__":
    key = jax.random.PRNGKey(0)
    k_x, k_w1, k_b1, k_w2, k_b2 = jax.random.split(key, 5)

    B_SMALL = 8          # small-batch (grid-free) path
    B_BIG = 1024         # tiled path: 2 batch tiles of 512

    x_big = jax.random.normal(k_x, (B_BIG, D_IN), dtype=jnp.float32)
    x_small = x_big[:B_SMALL]

    # Deterministic init mimicking nn.Linear's uniform(-1/sqrt(fan_in), +1/sqrt(fan_in)).
    lim1 = 1.0 / jnp.sqrt(jnp.float32(D_IN))
    lim2 = 1.0 / jnp.sqrt(jnp.float32(D_HID))
    # Stored pre-transposed: [in_features, out_features].
    w1_t = jax.random.uniform(k_w1, (D_IN, D_HID), jnp.float32, -lim1, lim1)
    b1 = jax.random.uniform(k_b1, (D_HID,), jnp.float32, -lim1, lim1)
    w2_t = jax.random.uniform(k_w2, (D_HID, D_OUT), jnp.float32, -lim2, lim2)
    b2 = jax.random.uniform(k_b2, (D_OUT,), jnp.float32, -lim2, lim2)

    # 1) Small-batch path, default bf16 operands / f32 accumulation.
    out_small = jax.block_until_ready(net_forward(x_small, w1_t, b1, w2_t, b2))
    ref_small = reference_forward(x_small, w1_t, b1, w2_t, b2)
    assert out_small.shape == (B_SMALL, D_OUT)
    assert out_small.dtype == x_small.dtype
    assert jnp.allclose(out_small, ref_small, atol=5e-2, rtol=5e-2)

    # 2) Tiled path (grid over 512-row batch tiles), default bf16 operands.
    out_big = jax.block_until_ready(net_forward(x_big, w1_t, b1, w2_t, b2))
    ref_big = reference_forward(x_big, w1_t, b1, w2_t, b2)
    assert out_big.shape == (B_BIG, D_OUT)
    assert jnp.allclose(out_big, ref_big, atol=5e-2, rtol=5e-2)

    # 3) Exact-precision path: f32 operands, tiled.
    out_f32 = jax.block_until_ready(
        net_forward(x_big, w1_t, b1, w2_t, b2, compute_dtype=jnp.float32))
    assert jnp.allclose(out_f32, ref_big, atol=1e-3, rtol=1e-3)

    print("KERNEL_OK")
</pallas_src>

<mosaic_0001>
module attributes {stable_mosaic.version = 11 : i64} {
  func.func @mlp_kernel(%arg0: memref<8x512xbf16, #tpu.memory_space<vmem>>, %arg1: memref<512x256xbf16, #tpu.memory_space<vmem>>, %arg2: memref<1x256xf32, #tpu.memory_space<vmem>>, %arg3: memref<256x512xbf16, #tpu.memory_space<vmem>>, %arg4: memref<1x512xf32, #tpu.memory_space<vmem>>, %arg5: memref<8x512xf32, #tpu.memory_space<vmem>>) attributes {dimension_semantics = [], scalar_prefetch = 0 : i64, scratch_operands = 0 : i64, tpu.core_type = #tpu.core_type<tc>} {
    %c0 = arith.constant 0 : index
    %c0_0 = arith.constant 0 : index
    %0 = vector.load %arg0[%c0, %c0_0] : memref<8x512xbf16, #tpu.memory_space<vmem>>, vector<8x512xbf16>
    %c0_1 = arith.constant 0 : index
    %c0_2 = arith.constant 0 : index
    %1 = vector.load %arg2[%c0_1, %c0_2] : memref<1x256xf32, #tpu.memory_space<vmem>>, vector<1x256xf32>
    %c0_3 = arith.constant 0 : index
    %c0_4 = arith.constant 0 : index
    %2 = vector.load %arg1[%c0_3, %c0_4] : memref<512x256xbf16, #tpu.memory_space<vmem>>, vector<512x256xbf16>
    %cst = arith.constant dense<0.000000e+00> : vector<8x256xf32>
    %3 = tpu.matmul %0, %2, %cst {dimension_numbers = #tpu.dot_dimension_numbers<[1], [0], [0], [1], [0, 0, 1, 1], [], []>} : vector<8x512xbf16>, vector<512x256xbf16>, vector<8x256xf32> -> vector<8x256xf32>
    %4 = vector.broadcast %1 : vector<1x256xf32> to vector<8x256xf32>
    %5 = arith.addf %4, %3 : vector<8x256xf32>
    %cst_5 = arith.constant 0.000000e+00 : f32
    %6 = vector.broadcast %cst_5 : f32 to vector<8x256xf32>
    %7 = arith.maximumf %5, %6 : vector<8x256xf32>
    %8 = arith.truncf %7 : vector<8x256xf32> to vector<8x256xbf16>
    %c0_6 = arith.constant 0 : index
    %c0_7 = arith.constant 0 : index
    %9 = vector.load %arg4[%c0_6, %c0_7] : memref<1x512xf32, #tpu.memory_space<vmem>>, vector<1x512xf32>
    %c0_8 = arith.constant 0 : index
    %c0_9 = arith.constant 0 : index
    %10 = vector.load %arg3[%c0_8, %c0_9] : memref<256x512xbf16, #tpu.memory_space<vmem>>, vector<256x512xbf16>
    %cst_10 = arith.constant dense<0.000000e+00> : vector<8x512xf32>
    %11 = tpu.matmul %8, %10, %cst_10 {dimension_numbers = #tpu.dot_dimension_numbers<[1], [0], [0], [1], [0, 0, 1, 1], [], []>} : vector<8x256xbf16>, vector<256x512xbf16>, vector<8x512xf32> -> vector<8x512xf32>
    %12 = vector.broadcast %9 : vector<1x512xf32> to vector<8x512xf32>
    %13 = arith.addf %12, %11 : vector<8x512xf32>
    %c0_11 = arith.constant 0 : index
    %c0_12 = arith.constant 0 : index
    %14 = vector.load %arg5[%c0_11, %c0_12] : memref<8x512xf32, #tpu.memory_space<vmem>>, vector<8x512xf32>
    tpu.vector_store %arg5[%c0_11, %c0_12], %13 {strides = array<i32>} : memref<8x512xf32, #tpu.memory_space<vmem>>, vector<8x512xf32>,
    return
  }
}

</mosaic_0001>

<bundles_post_ra>
// kernel: tpu_custom_call.1
= control target key start
LH: loop header
LB: loop body
LE: loop exit
PB: predicated region body
PF: predicated region fallthrough
CT: control target
= control target key end

     0   :  { %10 = vsyncpa [#allocation3], 0  ;;  %s1550_s0 = inlined_call_operand.hbm [shape: bf16[8,512], index: 0, kind: input, shape index: {}]   ;;  %s1551_s1 = inlined_call_operand.hbm [shape: bf16[512,256], index: 1, kind: input, shape index: {}]   ;;  %s1552_s2 = inlined_call_operand.vmem [shape: f32[1,256], index: 2, kind: input, shape index: {}]   ;;  %s1553_s3 = inlined_call_operand.hbm [shape: bf16[256,512], index: 3, kind: input, shape index: {}]   ;;  %s1554_s4 = inlined_call_operand.vmem [shape: f32[1,512], index: 4, kind: input, shape index: {}]   ;;  %s1555_s5 = inlined_call_operand.hbm [shape: f32[8,512], index: 5, kind: output, shape index: {}]  }
   0x1   :  { %11 = vsyncpa [#allocation6], 0 }
   0x2   :  { %12 = vsyncpa [#allocation4], 0  ;;  %s1494_s18 = smov [#allocation5]  }
   0x3   :  { %s28_s19 = sshll.u32 %s1494_s18, 4  ;;  %s29_s19 = int_to_ptr.vmem [resolvable:$true] %s28_s19 }
   0x4   :  { %s1416_s20 = scalar_lea.vmem %s29_s19, 8192  ;;  %p1421_p1 = scmp.lt.s32.totalorder %s29_s19, %s29_s19 }
   0x5   :  { %p1417_p0 = scmp.ne.s32.totalorder %s29_s19, %s1416_s20  ;;  %p1422_p2 = scmp.lt.s32.totalorder %s1416_s20, %s1416_s20 }
   0x7   :  { %p1423_p3 = por %p1422_p2, %p1421_p1 }
   0x9   :  { %p1424_p4 = pnand %p1423_p3, %p1417_p0 }
   0xb   :  { %1427 = shalt.err (!%p1424_p4)
}
   0xc   :  { %s1495_s21 = smov 128   ;;  %s1496_s22 = smov 8  }
   0xd   :  { %34 = dma.hbm_to_vmem [thread:$0]  %s1551_s1, 8192, %s29_s19, [#allocation6], %s1495_s21, %s1495_s21, %s1496_s22  }
   0xe   :  { %s1497_s25 = smov [#allocation2]   ;;  %s1498_s27 = smov [#allocation7]  }
   0xf   :  { %s19_s26 = sshll.u32 %s1497_s25, 4  ;;  %s42_s28 = sshll.u32 %s1498_s27, 4  ;;  %s20_s26 = int_to_ptr.vmem [resolvable:$true] %s19_s26  ;;  %s43_s28 = int_to_ptr.vmem [resolvable:$true] %s42_s28 }
  0x10   :  { %s1436_s29 = scalar_lea.vmem %s20_s26, 256  ;;  %p1441_p6 = scmp.lt.s32.totalorder %s20_s26, %s20_s26 }
  0x11   :  { %p1437_p5 = scmp.ne.s32.totalorder %s20_s26, %s1436_s29  ;;  %p1442_p7 = scmp.lt.s32.totalorder %s1436_s29, %s1436_s29 }
  0x13   :  { %p1443_p8 = por %p1442_p7, %p1441_p6 }
  0x15   :  { %p1444_p9 = pnand %p1443_p8, %p1437_p5 }
  0x17   :  { %1447 = shalt.err (!%p1444_p9)
}
  0x18   :  { %22 = dma.hbm_to_vmem [thread:$0]  %s1550_s0, 256, %s20_s26, [#allocation3]  }
  0x19   :  { %s1456_s7 = scalar_lea.vmem %s43_s28, 8192  ;;  %p1461_p11 = scmp.lt.s32.totalorder %s43_s28, %s43_s28 }
  0x1a   :  { %p1457_p10 = scmp.ne.s32.totalorder %s43_s28, %s1456_s7  ;;  %p1462_p12 = scmp.lt.s32.totalorder %s1456_s7, %s1456_s7 }
  0x1c   :  { %p1463_p13 = por %p1462_p12, %p1461_p11 }
  0x1e   :  { %p1464_p0 = pnand %p1463_p13, %p1457_p10 }
  0x20   :  { %1467 = shalt.err (!%p1464_p0)
}
  0x21   :  { %s1499_s1 = smov 256   ;;  %s1500_s8 = smov 16  }
  0x22   :  { %48 = dma.hbm_to_vmem [thread:$0]  %s1553_s3, 8192, %s43_s28, [#allocation6], %s1499_s1, %s1499_s1, %s1500_s8  }
  0x23   :  { %1488 = dma.done.wait [#allocation3], 256  }
  0x24   :  { %1489 = vsyncadd [#allocation3], 4294967040 }
  0x25   :  { %1490 = dma.done.wait [#allocation6], 16384  }
  0x26   :  { %1491 = vsyncadd [#allocation6], 4294950912  ;;  %v1212_v0 = vld [vmem:[#allocation5 + $0x74] ss:$8 sps:$4 sm:$0xff]   ;;  %v1216_v2 = vld [vmem:[#allocation5 + $0x70] ss:$8 sps:$4 sm:$0xff]  }
  0x27   :  { %v1214_v1 = vld [vmem:[#allocation5 + $0x174] ss:$8 sps:$4 sm:$0xff]   ;;  %461 = vmatprep.subr.bf16.mxu0 %v1212_v0  ;;  %v1217_v3 = vld [vmem:[#allocation5 + $0x170] ss:$8 sps:$4 sm:$0xff]   ;;  %v1218_v4 = vld [vmem:[#allocation5 + $0x64] ss:$8 sps:$4 sm:$0xff]  }
  0x28   :  { %502 = vmatprep.subr.bf16.mxu1 %v1214_v1  ;;  %462 = vmatpush1.bf16.msra.mxu0 %v1216_v2  ;;  %v1220_v5 = vld [vmem:[#allocation5 + $0x164] ss:$8 sps:$4 sm:$0xff]   ;;  %v1222_v6 = vld [vmem:[#allocation5 + $0x60] ss:$8 sps:$4 sm:$0xff]   ;;  %v1224_v8 = vld [vmem:[#allocation5 + $0x54] ss:$8 sps:$4 sm:$0xff]  }
  0x29   :  { %503 = vmatpush1.bf16.msra.mxu1 %v1217_v3  ;;  %463 = vmatprep.subr.bf16.mxu0 %v1218_v4  ;;  %v1223_v7 = vld [vmem:[#allocation5 + $0x160] ss:$8 sps:$4 sm:$0xff]   ;;  %v1226_v9 = vld [vmem:[#allocation5 + $0x154] ss:$8 sps:$4 sm:$0xff]   ;;  %v1228_v10 = vld [vmem:[#allocation5 + $0x50] ss:$8 sps:$4 sm:$0xff]  }
  0x2a   :  { %504 = vmatprep.subr.bf16.mxu1 %v1220_v5  ;;  %v1229_v11 = vld [vmem:[#allocation5 + $0x150] ss:$8 sps:$4 sm:$0xff]   ;;  %v1230_v12 = vld [vmem:[#allocation5 + $0x44] ss:$8 sps:$4 sm:$0xff]   ;;  %v1234_v14 = vld [vmem:[#allocation5 + $0x40] ss:$8 sps:$4 sm:$0xff]  }
  0x2b   :  { %v1232_v13 = vld [vmem:[#allocation5 + $0x144] ss:$8 sps:$4 sm:$0xff]   ;;  %v1235_v15 = vld [vmem:[#allocation5 + $0x140] ss:$8 sps:$4 sm:$0xff]   ;;  %v1236_v16 = vld [vmem:[#allocation5 + $0x34] ss:$8 sps:$4 sm:$0xff]  }
  0x2c   :  { %464 = vmatpush1.bf16.msra.mxu0 %v1222_v6  ;;  %v1238_v17 = vld [vmem:[#allocation5 + $0x134] ss:$8 sps:$4 sm:$0xff]   ;;  %v1240_v18 = vld [vmem:[#allocation5 + $0x30] ss:$8 sps:$4 sm:$0xff]   ;;  %v1242_v20 = vld [vmem:[#allocation5 + $0x24] ss:$8 sps:$4 sm:$0xff]  }
  0x2d   :  { %505 = vmatpush1.bf16.msra.mxu1 %v1223_v7  ;;  %465 = vmatprep.subr.bf16.mxu0 %v1224_v8  ;;  %v1241_v19 = vld [vmem:[#allocation5 + $0x130] ss:$8 sps:$4 sm:$0xff]   ;;  %v1244_v21 = vld [vmem:[#allocation5 + $0x124] ss:$8 sps:$4 sm:$0xff]   ;;  %v1246_v22 = vld [vmem:[#allocation5 + $0x20] ss:$8 sps:$4 sm:$0xff]  }
  0x2e   :  { %506 = vmatprep.subr.bf16.mxu1 %v1226_v9  ;;  %v1247_v23 = vld [vmem:[#allocation5 + $0x120] ss:$8 sps:$4 sm:$0xff]   ;;  %v1248_v24 = vld [vmem:[#allocation5 + $0x14] ss:$8 sps:$4 sm:$0xff]   ;;  %v1252_v26 = vld [vmem:[#allocation5 + $0x10] ss:$8 sps:$4 sm:$0xff]  }
  0x2f   :  { %v1250_v25 = vld [vmem:[#allocation5 + $0x114] ss:$8 sps:$4 sm:$0xff]   ;;  %v1253_v27 = vld [vmem:[#allocation5 + $0x110] ss:$8 sps:$4 sm:$0xff]   ;;  %v1254_v28 = vld [vmem:[#allocation5 + $0x4] ss:$8 sps:$4 sm:$0xff]  }
  0x30   :  { %466 = vmatpush1.bf16.msra.mxu0 %v1228_v10  ;;  %v1256_v29 = vld [vmem:[#allocation5 + $0x104] ss:$8 sps:$4 sm:$0xff]   ;;  %v1258_v30 = vld [vmem:[#allocation5] ss:$8 sps:$4 sm:$0xff]   ;;  %v1260_v32 = vld [vmem:[#allocation5 + $0xf4] ss:$8 sps:$4 sm:$0xff]  }
  0x31   :  { %507 = vmatpush1.bf16.msra.mxu1 %v1229_v11  ;;  %467 = vmatprep.subr.bf16.mxu0 %v1230_v12  ;;  %v1259_v31 = vld [vmem:[#allocation5 + $0x100] ss:$8 sps:$4 sm:$0xff]   ;;  %v1262_v33 = vld [vmem:[#allocation5 + $0x1f4] ss:$8 sps:$4 sm:$0xff]   ;;  %v1264_v34 = vld [vmem:[#allocation5 + $0xf0] ss:$8 sps:$4 sm:$0xff]  }
  0x32   :  { %508 = vmatprep.subr.bf16.mxu1 %v1232_v13  ;;  %v1265_v35 = vld [vmem:[#allocation5 + $0x1f0] ss:$8 sps:$4 sm:$0xff]   ;;  %v1266_v36 = vld [vmem:[#allocation5 + $0xe4] ss:$8 sps:$4 sm:$0xff]   ;;  %v1270_v38 = vld [vmem:[#allocation5 + $0xe0] ss:$8 sps:$4 sm:$0xff]  }
  0x33   :  { %v1268_v37 = vld [vmem:[#allocation5 + $0x1e4] ss:$8 sps:$4 sm:$0xff]   ;;  %v1271_v39 = vld [vmem:[#allocation5 + $0x1e0] ss:$8 sps:$4 sm:$0xff]   ;;  %v1272_v40 = vld [vmem:[#allocation5 + $0xd4] ss:$8 sps:$4 sm:$0xff]  }
  0x34   :  { %468 = vmatpush1.bf16.msra.mxu0 %v1234_v14  ;;  %v1274_v41 = vld [vmem:[#allocation5 + $0x1d4] ss:$8 sps:$4 sm:$0xff]   ;;  %v1276_v42 = vld [vmem:[#allocation5 + $0xd0] ss:$8 sps:$4 sm:$0xff]   ;;  %v1278_v44 = vld [vmem:[#allocation5 + $0xc4] ss:$8 sps:$4 sm:$0xff]  }
  0x35   :  { %509 = vmatpush1.bf16.msra.mxu1 %v1235_v15  ;;  %469 = vmatprep.subr.bf16.mxu0 %v1236_v16  ;;  %v1277_v43 = vld [vmem:[#allocation5 + $0x1d0] ss:$8 sps:$4 sm:$0xff]   ;;  %v1280_v45 = vld [vmem:[#allocation5 + $0x1c4] ss:$8 sps:$4 sm:$0xff]   ;;  %v1282_v49 = vld [vmem:[#allocation5 + $0xc0] ss:$8 sps:$4 sm:$0xff]  }
  0x36   :  { %510 = vmatprep.subr.bf16.mxu1 %v1238_v17  ;;  %v60_v46 = vld [vmem:[#allocation2] sm:$0xff]  ;;  %v61_v48 = vld [vmem:[#allocation2 + $0x8] sm:$0xff]  ;;  %v1283_v50 = vld [vmem:[#allocation5 + $0x1c0] ss:$8 sps:$4 sm:$0xff]   ;;  %s1501_s12 = smov [#allocation8]  }
  0x37   :  { %v1073_v47 = vcombine.high %v60_v46, %v60_v46  ;;  %v1075_v51 = vcombine.high %v61_v48, %v61_v48  ;;  %v1284_v52 = vld [vmem:[#allocation5 + $0xb4] ss:$8 sps:$4 sm:$0xff]   ;;  %v1288_v54 = vld [vmem:[#allocation5 + $0xb0] ss:$8 sps:$4 sm:$0xff]   ;;  %v1290_v56 = vld [vmem:[#allocation5 + $0xa4] ss:$8 sps:$4 sm:$0xff]   ;;  %v1072_v6 = vcombine.low %v60_v46, %v60_v46  ;;  %v1074_v7 = vcombine.low %v61_v48, %v61_v48 }
  0x38   :  { %470 = vmatpush1.bf16.msra.mxu0 %v1240_v18  ;;  %v1286_v53 = vld [vmem:[#allocation5 + $0x1b4] ss:$8 sps:$4 sm:$0xff]   ;;  %v1289_v55 = vld [vmem:[#allocation5 + $0x1b0] ss:$8 sps:$4 sm:$0xff]   ;;  %v1292_v57 = vld [vmem:[#allocation5 + $0x1a4] ss:$8 sps:$4 sm:$0xff]  }
  0x39   :  { %511 = vmatpush1.bf16.msra.mxu1 %v1241_v19  ;;  %471 = vmatprep.subr.bf16.mxu0 %v1242_v20  ;;  %v1294_v58 = vld [vmem:[#allocation5 + $0xa0] ss:$8 sps:$4 sm:$0xff]   ;;  %v1296_v60 = vld [vmem:[#allocation5 + $0x94] ss:$8 sps:$4 sm:$0xff]   ;;  %v1300_v62 = vld [vmem:[#allocation5 + $0x90] ss:$8 sps:$4 sm:$0xff]  }
  0x3a   :  { %512 = vmatprep.subr.bf16.mxu1 %v1244_v21  ;;  %493 = vmatprep.mubr.bf16.mxu0 %v1073_v47  ;;  %v1295_v59 = vld [vmem:[#allocation5 + $0x1a0] ss:$8 sps:$4 sm:$0xff]   ;;  %v1298_v61 = vld [vmem:[#allocation5 + $0x194] ss:$8 sps:$4 sm:$0xff]   ;;  %v1301_v63 = vld [vmem:[#allocation5 + $0x190] ss:$8 sps:$4 sm:$0xff]  }
  0x3b   :  { %534 = vmatprep.mubr.bf16.mxu1 %v1075_v51  ;;  %v1302_v0 = vld [vmem:[#allocation5 + $0x84] ss:$8 sps:$4 sm:$0xff]   ;;  %v1306_v2 = vld [vmem:[#allocation5 + $0x80] ss:$8 sps:$4 sm:$0xff]   ;;  %s1062_s13 = sshll.u32 %s1501_s12, 4  ;;  %s1063_s13 = int_to_ptr.vmem [resolvable:$true] %s1062_s13 }
  0x3c   :  { %472 = vmatpush1.bf16.msra.mxu0 %v1246_v22  ;;  %v1304_v1 = vld [vmem:[#allocation5 + $0x184] ss:$8 sps:$4 sm:$0xff]   ;;  %v1307_v3 = vld [vmem:[#allocation5 + $0x180] ss:$8 sps:$4 sm:$0xff]   ;;  %p1473_p2 = scmp.lt.s32.totalorder %s1063_s13, %s1063_s13 }
  0x3d   :  { %513 = vmatpush1.bf16.msra.mxu1 %v1247_v23  ;;  %473 = vmatprep.subr.bf16.mxu0 %v1248_v24  ;;  %v1314_v4 = vld [vmem:[#allocation7 + $0xe4] ss:$16 sps:$4 sm:$0xff]   ;;  %v1317_v5 = vld [vmem:[#allocation7 + $0xec] ss:$16 sps:$4 sm:$0xff]   ;;  %v1312_v8 = vld [vmem:[#allocation7 + $0xe0] ss:$16 sps:$4 sm:$0xff]  }
  0x3e   :  { %514 = vmatprep.subr.bf16.mxu1 %v1250_v25  ;;  %v1315_v9 = vld [vmem:[#allocation7 + $0xe8] ss:$16 sps:$4 sm:$0xff]   ;;  %v1320_v10 = vld [vmem:[#allocation7 + $0xc4] ss:$16 sps:$4 sm:$0xff]   ;;  %v1323_v11 = vld [vmem:[#allocation7 + $0xcc] ss:$16 sps:$4 sm:$0xff]  }
  0x3f   :  { %v1318_v12 = vld [vmem:[#allocation7 + $0xc0] ss:$16 sps:$4 sm:$0xff]   ;;  %v1321_v13 = vld [vmem:[#allocation7 + $0xc8] ss:$16 sps:$4 sm:$0xff]   ;;  %v1326_v14 = vld [vmem:[#allocation7 + $0xa4] ss:$16 sps:$4 sm:$0xff]  }
  0x40   :  { %474 = vmatpush1.bf16.msra.mxu0 %v1252_v26  ;;  %v1329_v15 = vld [vmem:[#allocation7 + $0xac] ss:$16 sps:$4 sm:$0xff]   ;;  %v1324_v16 = vld [vmem:[#allocation7 + $0xa0] ss:$16 sps:$4 sm:$0xff]   ;;  %v1327_v17 = vld [vmem:[#allocation7 + $0xa8] ss:$16 sps:$4 sm:$0xff]  }
  0x41   :  { %515 = vmatpush1.bf16.msra.mxu1 %v1253_v27  ;;  %475 = vmatprep.subr.bf16.mxu0 %v1254_v28  ;;  %v1332_v18 = vld [vmem:[#allocation7 + $0x84] ss:$16 sps:$4 sm:$0xff]   ;;  %v1335_v19 = vld [vmem:[#allocation7 + $0x8c] ss:$16 sps:$4 sm:$0xff]   ;;  %v1330_v20 = vld [vmem:[#allocation7 + $0x80] ss:$16 sps:$4 sm:$0xff]  }
  0x42   :  { %516 = vmatprep.subr.bf16.mxu1 %v1256_v29  ;;  %v1333_v21 = vld [vmem:[#allocation7 + $0x88] ss:$16 sps:$4 sm:$0xff]   ;;  %v1338_v22 = vld [vmem:[#allocation7 + $0x64] ss:$16 sps:$4 sm:$0xff]   ;;  %v1341_v23 = vld [vmem:[#allocation7 + $0x6c] ss:$16 sps:$4 sm:$0xff]  }
  0x43   :  { %v1336_v24 = vld [vmem:[#allocation7 + $0x60] ss:$16 sps:$4 sm:$0xff]   ;;  %v1339_v25 = vld [vmem:[#allocation7 + $0x68] ss:$16 sps:$4 sm:$0xff]   ;;  %v1344_v26 = vld [vmem:[#allocation7 + $0x44] ss:$16 sps:$4 sm:$0xff]  }
  0x44   :  { %476 = vmatpush1.bf16.msra.mxu0 %v1258_v30  ;;  %v1347_v27 = vld [vmem:[#allocation7 + $0x4c] ss:$16 sps:$4 sm:$0xff]   ;;  %v1342_v28 = vld [vmem:[#allocation7 + $0x40] ss:$16 sps:$4 sm:$0xff]   ;;  %v1345_v29 = vld [vmem:[#allocation7 + $0x48] ss:$16 sps:$4 sm:$0xff]  }
  0x45   :  { %517 = vmatpush1.bf16.msra.mxu1 %v1259_v31  ;;  %477 = vmatprep.subr.bf16.mxu0 %v1260_v32  ;;  %v1350_v30 = vld [vmem:[#allocation7 + $0x24] ss:$16 sps:$4 sm:$0xff]   ;;  %v1353_v31 = vld [vmem:[#allocation7 + $0x2c] ss:$16 sps:$4 sm:$0xff]   ;;  %v1348_v32 = vld [vmem:[#allocation7 + $0x20] ss:$16 sps:$4 sm:$0xff]  }
  0x46   :  { %518 = vmatprep.subr.bf16.mxu1 %v1262_v33  ;;  %v1351_v33 = vld [vmem:[#allocation7 + $0x28] ss:$16 sps:$4 sm:$0xff]   ;;  %v1374_v46 = vld [vmem:[#allocation7 + $0x1a4] ss:$16 sps:$4 sm:$0xff]   ;;  %v1377_v47 = vld [vmem:[#allocation7 + $0x1ac] ss:$16 sps:$4 sm:$0xff]  }
  0x47   :  { %v1372_v48 = vld [vmem:[#allocation7 + $0x1a0] ss:$16 sps:$4 sm:$0xff]   ;;  %v1383_v51 = vld [vmem:[#allocation7 + $0x18c] ss:$16 sps:$4 sm:$0xff]  }
  0x48   :  { %478 = vmatpush2.bf16.msra.mxu0 %v1264_v34  ;;  %v1356_v34 = vld [vmem:[#allocation7 + $0x4] ss:$16 sps:$4 sm:$0xff]  }
  0x49   :  { %519 = vmatpush2.bf16.msra.mxu1 %v1265_v35  ;;  %479 = vmatprep.subr.bf16.mxu0 %v1266_v36  ;;  %v1359_v35 = vld [vmem:[#allocation7 + $0xc] ss:$16 sps:$4 sm:$0xff]   ;;  %v1354_v36 = vld [vmem:[#allocation7] ss:$16 sps:$4 sm:$0xff]  }
  0x4a   :  { %520 = vmatprep.subr.bf16.mxu1 %v1268_v37  ;;  %v1357_v37 = vld [vmem:[#allocation7 + $0x8] ss:$16 sps:$4 sm:$0xff]  }
  0x4c   :  { %480 = vmatpush2.bf16.msra.mxu0 %v1270_v38  ;;  %v1362_v38 = vld [vmem:[#allocation7 + $0x1e4] ss:$16 sps:$4 sm:$0xff]  }
  0x4d   :  { %521 = vmatpush2.bf16.msra.mxu1 %v1271_v39  ;;  %481 = vmatprep.subr.bf16.mxu0 %v1272_v40  ;;  %v1365_v39 = vld [vmem:[#allocation7 + $0x1ec] ss:$16 sps:$4 sm:$0xff]   ;;  %v1360_v40 = vld [vmem:[#allocation7 + $0x1e0] ss:$16 sps:$4 sm:$0xff]  }
  0x4e   :  { %522 = vmatprep.subr.bf16.mxu1 %v1274_v41  ;;  %v1363_v41 = vld [vmem:[#allocation7 + $0x1e8] ss:$16 sps:$4 sm:$0xff]  }
  0x50   :  { %482 = vmatpush2.bf16.msra.mxu0 %v1276_v42  ;;  %v1368_v42 = vld [vmem:[#allocation7 + $0x1c4] ss:$16 sps:$4 sm:$0xff]  }
  0x51   :  { %523 = vmatpush2.bf16.msra.mxu1 %v1277_v43  ;;  %483 = vmatprep.subr.bf16.mxu0 %v1278_v44  ;;  %v1371_v43 = vld [vmem:[#allocation7 + $0x1cc] ss:$16 sps:$4 sm:$0xff]   ;;  %v1366_v44 = vld [vmem:[#allocation7 + $0x1c0] ss:$16 sps:$4 sm:$0xff]  }
  0x52   :  { %524 = vmatprep.subr.bf16.mxu1 %v1280_v45  ;;  %v1369_v45 = vld [vmem:[#allocation7 + $0x1c8] ss:$16 sps:$4 sm:$0xff]  }
  0x54   :  { %484 = vmatpush2.bf16.msra.mxu0 %v1282_v49  ;;  %v1375_v49 = vld [vmem:[#allocation7 + $0x1a8] ss:$16 sps:$4 sm:$0xff]  }
  0x55   :  { %525 = vmatpush2.bf16.msra.mxu1 %v1283_v50  ;;  %485 = vmatprep.subr.bf16.mxu0 %v1284_v52  ;;  %v1380_v50 = vld [vmem:[#allocation7 + $0x184] ss:$16 sps:$4 sm:$0xff]   ;;  %v1378_v52 = vld [vmem:[#allocation7 + $0x180] ss:$16 sps:$4 sm:$0xff]  }
  0x56   :  { %526 = vmatprep.subr.bf16.mxu1 %v1286_v53  ;;  %v1381_v53 = vld [vmem:[#allocation7 + $0x188] ss:$16 sps:$4 sm:$0xff]  }
  0x58   :  { %486 = vmatpush2.bf16.msra.mxu0 %v1288_v54  ;;  %v1386_v54 = vld [vmem:[#allocation7 + $0x164] ss:$16 sps:$4 sm:$0xff]  }
  0x59   :  { %527 = vmatpush2.bf16.msra.mxu1 %v1289_v55  ;;  %487 = vmatprep.subr.bf16.mxu0 %v1290_v56  ;;  %v1389_v55 = vld [vmem:[#allocation7 + $0x16c] ss:$16 sps:$4 sm:$0xff]   ;;  %v1384_v56 = vld [vmem:[#allocation7 + $0x160] ss:$16 sps:$4 sm:$0xff]  }
  0x5a   :  { %528 = vmatprep.subr.bf16.mxu1 %v1292_v57  ;;  %v1387_v57 = vld [vmem:[#allocation7 + $0x168] ss:$16 sps:$4 sm:$0xff]  }
  0x5c   :  { %488 = vmatpush2.bf16.msra.mxu0 %v1294_v58  ;;  %v1392_v58 = vld [vmem:[#allocation7 + $0x144] ss:$16 sps:$4 sm:$0xff]  }
  0x5d   :  { %529 = vmatpush2.bf16.msra.mxu1 %v1295_v59  ;;  %489 = vmatprep.subr.bf16.mxu0 %v1296_v60  ;;  %v1395_v59 = vld [vmem:[#allocation7 + $0x14c] ss:$16 sps:$4 sm:$0xff]   ;;  %v1390_v60 = vld [vmem:[#allocation7 + $0x140] ss:$16 sps:$4 sm:$0xff]  }
  0x5e   :  { %530 = vmatprep.subr.bf16.mxu1 %v1298_v61  ;;  %v1393_v61 = vld [vmem:[#allocation7 + $0x148] ss:$16 sps:$4 sm:$0xff]  }
  0x60   :  { %490 = vmatpush2.bf16.msra.mxu0 %v1300_v62  ;;  %v1398_v62 = vld [vmem:[#allocation7 + $0x124] ss:$16 sps:$4 sm:$0xff]  }
  0x61   :  { %531 = vmatpush2.bf16.msra.mxu1 %v1301_v63  ;;  %491 = vmatprep.subr.bf16.mxu0 %v1302_v0  ;;  %v1401_v63 = vld [vmem:[#allocation7 + $0x12c] ss:$16 sps:$4 sm:$0xff]   ;;  %v1396_v0 = vld [vmem:[#allocation7 + $0x120] ss:$16 sps:$4 sm:$0xff]  }
  0x62   :  { %532 = vmatprep.subr.bf16.mxu1 %v1304_v1  ;;  %v1399_v1 = vld [vmem:[#allocation7 + $0x128] ss:$16 sps:$4 sm:$0xff]  }
  0x64   :  { %492 = vmatpush2.bf16.msra.mxu0 %v1306_v2  ;;  %v1404_v2 = vld [vmem:[#allocation7 + $0x104] ss:$16 sps:$4 sm:$0xff]  }
  0x65   :  { %533 = vmatpush2.bf16.msra.mxu1 %v1307_v3  ;;  %945 = vmatprep.subr.bf16.mxu0 %v1314_v4  ;;  %v1407_v3 = vld [vmem:[#allocation7 + $0x10c] ss:$16 sps:$4 sm:$0xff]   ;;  %v1402_v4 = vld [vmem:[#allocation7 + $0x100] ss:$16 sps:$4 sm:$0xff]  }
  0x66   :  { %986 = vmatprep.subr.bf16.mxu1 %v1317_v5  ;;  %v1405_v5 = vld [vmem:[#allocation7 + $0x108] ss:$16 sps:$4 sm:$0xff]  }
  0x67   :  { %494 = vmatmul.mubr.bf16.vlgmr.msra.gmra.mxu0 %v1072_v6  ;;  %v544_v6 = vlaneseq }
  0x68   :  { %535 = vmatmul.mubr.bf16.vlgmr.msra.gmra.mxu1 %v1074_v7  ;;  %946 = vmatpush1.bf16.msra.mxu0 %v1312_v8 }
  0x69   :  { %987 = vmatpush1.bf16.msra.mxu1 %v1315_v9  ;;  %947 = vmatprep.subr.bf16.mxu0 %v1320_v10  ;;  %v545_v7 = vshrl.u32 %v544_v6, 7  ;;  %v62_v9 = vld [vmem:[%s1552_s2] sm:$0x3] }
  0x6a   :  { %988 = vmatprep.subr.bf16.mxu1 %v1323_v11 }
  0x6b   :  { %v546_v8 = vsub.s32 0, %v545_v7  ;;  %v550_v10 = vsub.s32 1, %v545_v7 }
  0x6c   :  { %948 = vmatpush1.bf16.msra.mxu0 %v1318_v12 }
  0x6d   :  { %989 = vmatpush1.bf16.msra.mxu1 %v1321_v13  ;;  %949 = vmatprep.subr.bf16.mxu0 %v1326_v14  ;;  %v547_v11 = vrot.slane %v62_v9, %v546_v8 }
  0x6e   :  { %990 = vmatprep.subr.bf16.mxu1 %v1329_v15  ;;  %v551_v15 = vrot.slane %v62_v9, %v550_v10 }
  0x70   :  { %950 = vmatpush1.bf16.msra.mxu0 %v1324_v16 }
  0x71   :  { %991 = vmatpush1.bf16.msra.mxu1 %v1327_v17  ;;  %951 = vmatprep.subr.bf16.mxu0 %v1332_v18 }
  0x72   :  { %992 = vmatprep.subr.bf16.mxu1 %v1335_v19 }
  0x74   :  { %952 = vmatpush1.bf16.msra.mxu0 %v1330_v20 }
  0x75   :  { %993 = vmatpush1.bf16.msra.mxu1 %v1333_v21  ;;  %953 = vmatprep.subr.bf16.mxu0 %v1338_v22 }
  0x76   :  { %994 = vmatprep.subr.bf16.mxu1 %v1341_v23 }
  0x78   :  { %954 = vmatpush1.bf16.msra.mxu0 %v1336_v24 }
  0x79   :  { %995 = vmatpush1.bf16.msra.mxu1 %v1339_v25  ;;  %955 = vmatprep.subr.bf16.mxu0 %v1344_v26 }
  0x7a   :  { %996 = vmatprep.subr.bf16.mxu1 %v1347_v27 }
  0x7c   :  { %956 = vmatpush1.bf16.msra.mxu0 %v1342_v28 }
  0x7d   :  { %997 = vmatpush1.bf16.msra.mxu1 %v1345_v29  ;;  %957 = vmatprep.subr.bf16.mxu0 %v1350_v30  ;;  %v1038_v29 = vsub.s32 2, %v545_v7  ;;  %v560_v30 = vld [vmem:[%s1554_s4] sm:$0xf]  ;;  %s1468_s4 = scalar_lea.vmem %s1063_s13, 512 }
  0x7e   :  { %998 = vmatprep.subr.bf16.mxu1 %v1353_v31  ;;  %v1042_v31 = vsub.s32 3, %v545_v7  ;;  %p1469_p1 = scmp.ne.s32.totalorder %s1063_s13, %s1468_s4  ;;  %p1474_p3 = scmp.lt.s32.totalorder %s1468_s4, %s1468_s4 }
  0x80   :  { %958 = vmatpush1.bf16.msra.mxu0 %v1348_v32  ;;  %v1031_v32 = vrot.slane %v560_v30, %v546_v8  ;;  %p1475_p4 = por %p1474_p3, %p1473_p2 }
  0x81   :  { %999 = vmatpush1.bf16.msra.mxu1 %v1351_v33  ;;  %959 = vmatprep.subr.bf16.mxu0 %v1356_v34  ;;  %v1039_v33 = vrot.slane %v560_v30, %v1038_v29  ;;  %v1035_v34 = vrot.slane %v560_v30, %v550_v10 }
  0x82   :  { %1000 = vmatprep.subr.bf16.mxu1 %v1359_v35  ;;  %v1043_v35 = vrot.slane %v560_v30, %v1042_v31  ;;  %p1476_p5 = pnand %p1475_p4, %p1469_p1 }
  0x84   :  { %960 = vmatpush1.bf16.msra.mxu0 %v1354_v36 }
  0x85   :  { %1001 = vmatpush1.bf16.msra.mxu1 %v1357_v37  ;;  %961 = vmatprep.subr.bf16.mxu0 %v1362_v38 }
  0x86   :  { %1002 = vmatprep.subr.bf16.mxu1 %v1365_v39 }
  0x88   :  { %962 = vmatpush2.bf16.msra.mxu0 %v1360_v40 }
  0x89   :  { %1003 = vmatpush2.bf16.msra.mxu1 %v1363_v41  ;;  %963 = vmatprep.subr.bf16.mxu0 %v1368_v42 }
  0x8a   :  { %1004 = vmatprep.subr.bf16.mxu1 %v1371_v43 }
  0x8c   :  { %964 = vmatpush2.bf16.msra.mxu0 %v1366_v44 }
  0x8d   :  { %1005 = vmatpush2.bf16.msra.mxu1 %v1369_v45  ;;  %965 = vmatprep.subr.bf16.mxu0 %v1374_v46 }
  0x8e   :  { %1006 = vmatprep.subr.bf16.mxu1 %v1377_v47 }
  0x90   :  { %966 = vmatpush2.bf16.msra.mxu0 %v1372_v48 }
  0x91   :  { %1007 = vmatpush2.bf16.msra.mxu1 %v1375_v49  ;;  %967 = vmatprep.subr.bf16.mxu0 %v1380_v50 }
  0x92   :  { %1008 = vmatprep.subr.bf16.mxu1 %v1383_v51 }
  0x94   :  { %968 = vmatpush2.bf16.msra.mxu0 %v1378_v52 }
  0x95   :  { %1009 = vmatpush2.bf16.msra.mxu1 %v1381_v53  ;;  %969 = vmatprep.subr.bf16.mxu0 %v1386_v54 }
  0x96   :  { %1010 = vmatprep.subr.bf16.mxu1 %v1389_v55 }
  0x98   :  { %970 = vmatpush2.bf16.msra.mxu0 %v1384_v56 }
  0x99   :  { %1011 = vmatpush2.bf16.msra.mxu1 %v1387_v57  ;;  %971 = vmatprep.subr.bf16.mxu0 %v1392_v58 }
  0x9a   :  { %1012 = vmatprep.subr.bf16.mxu1 %v1395_v59 }
  0x9c   :  { %972 = vmatpush2.bf16.msra.mxu0 %v1390_v60 }
  0x9d   :  { %1013 = vmatpush2.bf16.msra.mxu1 %v1393_v61  ;;  %973 = vmatprep.subr.bf16.mxu0 %v1398_v62 }
  0x9e   :  { %1014 = vmatprep.subr.bf16.mxu1 %v1401_v63 }
  0xa0   :  { %974 = vmatpush2.bf16.msra.mxu0 %v1396_v0 }
  0xa1   :  { %1015 = vmatpush2.bf16.msra.mxu1 %v1399_v1  ;;  %975 = vmatprep.subr.bf16.mxu0 %v1404_v2 }
  0xa2   :  { %1016 = vmatprep.subr.bf16.mxu1 %v1407_v3 }
  0xa4   :  { %976 = vmatpush2.bf16.msra.mxu0 %v1402_v4 }
  0xa5   :  { %1017 = vmatpush2.bf16.msra.mxu1 %v1405_v5 }
 0x127   :  { %v495_v12 = vpop.f32.mrf.mxu0 }
 0x128   :  { %v536_v13 = vpop.f32.mrf.mxu1 }
 0x129   :  { %v537_v14 = vadd.f32 %v536_v13, %v495_v12  ;;  %v497_v16 = vpop.f32.mrf.mxu0 }
 0x12a   :  { %v538_v17 = vpop.f32.mrf.mxu1 }
 0x12b   :  { %v554_v18 = vadd.f32 %v547_v11, %v537_v14  ;;  %v539_v19 = vadd.f32 %v538_v17, %v497_v16  ;;  %v499_v20 = vpop.f32.mrf.mxu0 }
 0x12c   :  { %v540_v21 = vpop.f32.mrf.mxu1 }
 0x12d   :  { %v555_v22 = vadd.f32 %v551_v15, %v539_v19  ;;  %v556_v23 = vmax.f32 %v554_v18, 0.0  ;;  %v500_v24 = vpop.f32.mrf.mxu0 }
 0x12e   :  { %v541_v25 = vpop.f32.mrf.mxu1 }
 0x12f   :  { %v557_v26 = vmax.f32 %v555_v22, 0.0  ;;  %v558_v28 = vpack.c.bf16 %v556_v23, %v556_v23 }
 0x131   :  { %v559_v27 = vpack.c.bf16 %v557_v26, %v557_v26 }
 0x133   :  { %977 = vmatprep.mubr.bf16.mxu0 %v559_v27  ;;  %1018 = vmatprep.mubr.bf16.mxu1 %v559_v27 }
 0x134   :  { %978 = vmatmul.mubr.bf16.vlgmr.msra.gmra.mxu0 %v558_v28  ;;  %1019 = vmatmul.mubr.bf16.vlgmr.msra.gmra.mxu1 %v558_v28 }
 0x1f4   :  { %v979_v36 = vpop.f32.mrf.mxu0  ;;  %v1020_v37 = vpop.f32.mrf.mxu1 }
 0x1f5   :  { %v1048_v38 = vadd.f32 %v1031_v32, %v979_v36  ;;  %v1050_v39 = vadd.f32 %v1039_v33, %v1020_v37 }
 0x1f6   :  { %v981_v40 = vpop.f32.mrf.mxu0  ;;  %v1022_v41 = vpop.f32.mrf.mxu1 }
 0x1f7   :  { %1052 = vst [vmem:[#allocation8] sm:$0xff] %v1048_v38  ;;  %1054 = vst [vmem:[#allocation8 + $0x10] sm:$0xff] %v1050_v39  ;;  %v1049_v42 = vadd.f32 %v1035_v34, %v981_v40  ;;  %v1051_v43 = vadd.f32 %v1043_v35, %v1022_v41 }
 0x1f8   :  { %v983_v44 = vpop.f32.mrf.mxu0  ;;  %v1024_v45 = vpop.f32.mrf.mxu1 }
 0x1f9   :  { %1053 = vst [vmem:[#allocation8 + $0x8] sm:$0xff] %v1049_v42  ;;  %1055 = vst [vmem:[#allocation8 + $0x18] sm:$0xff] %v1051_v43 }
 0x1fa   :  { %v984_v46 = vpop.f32.mrf.mxu0  ;;  %v1025_v47 = vpop.f32.mrf.mxu1 }
 0x1fb   :  { %1479 = shalt.err (!%p1476_p5)
}
 0x1fc   :  { %1065 = dma.vmem_to_hbm [thread:$0]  %s1063_s13, 512, %s1555_s5, [#allocation4]  }
 0x1fd   :  { %1492 = dma.done.wait [#allocation4], 512  }
 0x1fe   :  { %1493 = vsyncadd [#allocation4], 4294966784 }
 0x1ff   :  { %1069 = vsyncpa [#allocation3], 1 }
 0x200   :  { %1070 = vsyncpa [#allocation6], 1 }
 0x201   :  { %1071 = vsyncpa [#allocation4], 1 }

</bundles_post_ra>
